<compile_context>
chip_gen: v6e
topology: v6e:2x2x1
jax: 0.10.0
libtpu: 0.0.40
codegen_flags: <defaults>
</compile_context>

<pallas_src>
import functools

import numpy as np
import jax
import jax.numpy as jnp
from jax import lax
from jax.experimental import pallas as pl
from jax.experimental.pallas import tpu as pltpu


def _round_up(x, m):
    return ((x + m - 1) // m) * m


def _dot_t(a, b):
    """a: [M, K], b: [N, K] -> [M, N] contracting the shared last dim, f32 acc."""
    return lax.dot_general(a, b, (((1,), (1,)), ((), ())),
                           preferred_element_type=jnp.float32)


# ----------------------------- generic linear -----------------------------

def _linear_kernel(x_ref, w_ref, b_ref, o_ref, *, relu):
    y = jnp.dot(x_ref[...], w_ref[...],
                preferred_element_type=jnp.float32) + b_ref[...]
    if relu:
        y = jnp.maximum(y, 0.0)
    o_ref[...] = y


def linear(x, w_t, b, n_out, relu=False):
    """x: [M, K]; w_t: [K, Np] bf16 (pre-padded to a 128 multiple); b: [1, Np] f32.
    Returns [M, n_out] f32."""
    M, K = x.shape
    Np = w_t.shape[1]
    Mp = _round_up(M, 8)
    tm = min(Mp, 256)
    Mp = _round_up(Mp, tm)
    tn = Np if Np <= 512 else (512 if Np % 512 == 0 else 128)
    xb = x.astype(jnp.bfloat16)
    if Mp != M:
        xb = jnp.pad(xb, ((0, Mp - M), (0, 0)))
    out = pl.pallas_call(
        functools.partial(_linear_kernel, relu=relu),
        out_shape=jax.ShapeDtypeStruct((Mp, Np), jnp.float32),
        grid_spec=pltpu.PrefetchScalarGridSpec(
            num_scalar_prefetch=0,
            # weight-tile axis outermost -> the (K, tn) weight block stays
            # VMEM-resident across the whole inner M sweep.
            grid=(Np // tn, Mp // tm),
            in_specs=[pl.BlockSpec((tm, K), lambda j, i: (i, 0)),
                      pl.BlockSpec((K, tn), lambda j, i: (0, j)),
                      pl.BlockSpec((1, tn), lambda j, i: (0, j))],
            out_specs=pl.BlockSpec((tm, tn), lambda j, i: (i, j))),
        compiler_params=pltpu.CompilerParams(
            dimension_semantics=("parallel", "parallel")),
    )(xb, w_t, b)
    if Mp != M or Np != n_out:
        out = out[:M, :n_out]
    return out


# ------------------- TransformerConv + conv1 fused kernel -------------------

def _conv_attn_kernel(q_ref, k_ref, v_ref, skip_ref, eh_ref, sinc_ref, dinc_ref,
                      w1_ref, b1_ref, o_ref, *, H, inv_sqrt_c):
    bf16 = jnp.bfloat16
    s_b = sinc_ref[...]                           # [Np, E] bf16 src incidence
    d_b = dinc_ref[...]                           # [TQ, E] bf16 dst incidence
    d_f = d_b.astype(jnp.float32)
    # adjacency of this query tile, derived from the incidences on the MXU
    edge_cnt = _dot_t(d_b, s_b)                   # [TQ, Np] (#edges per (i, j))
    has_edge = edge_cnt > 0.5
    adj = has_edge.astype(jnp.float32)

    heads = []
    for h in range(H):                            # static; heads stay in-kernel
        qh = q_ref[h].astype(bf16)                # [TQ, C]
        kh = k_ref[h].astype(bf16)                # [Np, C]
        vh = v_ref[h].astype(bf16)                # [Np, C]
        ehh = eh_ref[h].astype(bf16)              # [E, C]  (edge space)
        # scores = q_i . (k_j + e_ij) / sqrt(C); the e term stays edge-sized.
        s_qk = _dot_t(qh, kh)                                         # [TQ, Np]
        qe = _dot_t(qh, ehh)                                          # [TQ, E]
        s_qe = _dot_t((qe * d_f).astype(bf16), s_b)                   # [TQ, Np]
        scores = (s_qk + s_qe) * inv_sqrt_c
        scores = jnp.where(has_edge, scores, jnp.float32(-1e30))
        m = jnp.max(scores, axis=-1, keepdims=True)
        p = jnp.exp(scores - m) * adj
        denom = jnp.maximum(jnp.sum(p, axis=-1, keepdims=True),
                            jnp.float32(1e-30))
        alpha = p / denom                                             # f32 softmax
        a16 = alpha.astype(bf16)
        # out_i = sum_j alpha_ij (v_j + e_ij); the e part via incidences.
        out_v = jnp.dot(a16, vh, preferred_element_type=jnp.float32)  # [TQ, C]
        a_e = jnp.dot(a16, s_b, preferred_element_type=jnp.float32)   # [TQ, E]
        out_e = jnp.dot((a_e * d_f).astype(bf16), ehh,
                        preferred_element_type=jnp.float32)           # [TQ, C]
        heads.append(out_v + out_e + skip_ref[h])
    # F.relu(conv0(...)) then fused contract_conv1 + relu (lane-dense output).
    conv_out = jnp.maximum(jnp.concatenate(heads, axis=-1), 0.0)      # [TQ, H*C]
    y = jnp.dot(conv_out.astype(bf16), w1_ref[...],
                preferred_element_type=jnp.float32) + b1_ref[...]
    o_ref[...] = jnp.maximum(y, 0.0)


# --------------------------- fused encode kernel ---------------------------

def _encode_kernel(mixed_ref, aa_ref, pw_ref, pb_ref, wih_ref, bih_ref,
                   whh_ref, bhh_ref, aw_ref, ab_ref, mask_ref,
                   out_ref, inv_ref, *, T, Bp, B, A, O):
    bf16 = jnp.bfloat16
    # invariant_projection (+relu) and the GRU input gates in one shot.
    h1 = jnp.dot(mixed_ref[...].astype(bf16), pw_ref[...],
                 preferred_element_type=jnp.float32) + pb_ref[...]
    h1 = jnp.maximum(h1, 0.0)                                        # [T*Bp, Hd]
    xg = jnp.dot(h1.astype(bf16), wih_ref[...],
                 preferred_element_type=jnp.float32) + bih_ref[...]  # [T*Bp, 3O]
    whh = whh_ref[...]                                               # [O, 3O]
    bhh = bhh_ref[...]                                               # [1, 3O]
    h = jnp.zeros((Bp, O), jnp.float32)
    for t in range(T):            # static unroll; recurrence stays f32
        xgt = xg[t * Bp:(t + 1) * Bp, :]                             # [Bp, 3O]
        hg = jnp.dot(h, whh, preferred_element_type=jnp.float32) + bhh
        r = jax.nn.sigmoid(xgt[:, :O] + hg[:, :O])
        z = jax.nn.sigmoid(xgt[:, O:2 * O] + hg[:, O:2 * O])
        n = jnp.tanh(xgt[:, 2 * O:] + r * hg[:, 2 * O:])
        h = (1.0 - z) * n + z * h
    inv_ref[...] = h
    # action_projection|action_bias fused matmul, batched mat-vec vs [inv | 1],
    # then torch's max(log(mask), finfo.min) applied in-kernel.
    pab = jnp.dot(aa_ref[...].astype(bf16), aw_ref[...],
                  preferred_element_type=jnp.float32) + ab_ref[...]  # [B*A, O+1]
    pab = pab.reshape(B, A, O + 1)
    inv_aug = jnp.concatenate([h[:B], jnp.ones((B, 1), jnp.float32)], axis=1)
    s = jnp.sum(pab * inv_aug[:, None, :], axis=-1)                  # [B, A]
    fmin = jnp.float32(np.finfo(np.float32).min)
    inf_mask = jnp.maximum(jnp.log(mask_ref[...]), fmin)
    out_ref[...] = s + inf_mask


# ----------------------------- model assembly -----------------------------

def build_forward(config):
    D = config['token_embedding_dim']
    H = config['conv_heads']
    O = config['invariant_out_dim']
    HD = H * D
    inv_sqrt_c = float(1.0 / np.sqrt(D))      # out_channels == token_embedding_dim

    @jax.jit
    def graph_repr(params, x_tok, edge_attr_tok, edge_index):
        N = x_tok.shape[0]
        E = edge_attr_tok.shape[0]
        Np = _round_up(N, 8)
        if Np > 128:
            Np = _round_up(N, 128)
        TQ = min(Np, 128)
        Dp = params['conv1_w'].shape[1]

        x = jnp.take(params['tok_emb'], x_tok, axis=0)               # [N, D]
        e_attr = jnp.take(params['tok_emb'], edge_attr_tok, axis=0)  # [E, D]
        x = jnp.pad(x, ((0, Np - N), (0, 0)))
        # fused q|k|v|skip projection (one 4HD-wide lane-dense matmul) and the
        # bias-free edge projection (conv_dropout skipped: eval -> no-op).
        qkvs = linear(x, params['wqkvs_w'], params['wqkvs_b'], 4 * HD)   # [Np, 4HD]
        e_proj = linear(e_attr, params['we_w'], params['we_b'], HD)      # [E, HD]

        def to_heads(a):
            return a.reshape(-1, H, D).transpose(1, 0, 2)

        q = to_heads(qkvs[:, 0 * HD:1 * HD])
        k = to_heads(qkvs[:, 1 * HD:2 * HD])
        v = to_heads(qkvs[:, 2 * HD:3 * HD])
        skip = to_heads(qkvs[:, 3 * HD:4 * HD])
        eh = to_heads(e_proj)                                            # [H, E, D]

        # 0/1 incidence matrices (broadcast compare; no scatter, no N^2*C tensor)
        # TODO(synk): duplicate (dst, src) edges are merged (their e terms sum);
        # a true multigraph needs PyG's per-edge segment softmax instead.
        src = edge_index[0]
        dst = edge_index[1]
        ids = jnp.arange(Np, dtype=src.dtype)
        src_inc = (ids[:, None] == src[None, :]).astype(jnp.bfloat16)    # [Np, E]
        dst_inc = (ids[:, None] == dst[None, :]).astype(jnp.bfloat16)    # [Np, E]

        # TODO(synk): for very large graphs add a key/edge grid axis with online
        # softmax (and raise vmem_limit_bytes); here full key/edge sets fit VMEM.
        out = pl.pallas_call(
            functools.partial(_conv_attn_kernel, H=H, inv_sqrt_c=inv_sqrt_c),
            out_shape=jax.ShapeDtypeStruct((Np, Dp), jnp.float32),
            grid_spec=pltpu.PrefetchScalarGridSpec(
                num_scalar_prefetch=0,
                grid=(Np // TQ,),
                in_specs=[
                    pl.BlockSpec((H, TQ, D), lambda i: (0, i, 0)),   # q
                    pl.BlockSpec((H, Np, D), lambda i: (0, 0, 0)),   # k
                    pl.BlockSpec((H, Np, D), lambda i: (0, 0, 0)),   # v
                    pl.BlockSpec((H, TQ, D), lambda i: (0, i, 0)),   # skip
                    pl.BlockSpec((H, E, D), lambda i: (0, 0, 0)),    # e (edge space)
                    pl.BlockSpec((Np, E), lambda i: (0, 0)),         # src incidence
                    pl.BlockSpec((TQ, E), lambda i: (i, 0)),         # dst incidence
                    pl.BlockSpec((HD, Dp), lambda i: (0, 0)),        # conv1 W (bf16)
                    pl.BlockSpec((1, Dp), lambda i: (0, 0)),         # conv1 b
                ],
                out_specs=pl.BlockSpec((TQ, Dp), lambda i: (i, 0))),
            compiler_params=pltpu.CompilerParams(
                dimension_semantics=("parallel",)),
        )(q, k, v, skip, eh, src_inc, dst_inc,
          params['conv1_w'], params['conv1_b'])
        return out[:N, :D]

    @jax.jit
    def encode(params, reprs, inv_tok, inv_node, aa_tok, aa_node, mask):
        B, T = inv_tok.shape
        A = aa_tok.shape[1]
        Bp = _round_up(B, 8)
        gather = jax.vmap(lambda r, idx: jnp.take(r, idx, axis=0))

        # mixed_embedding (token + per-graph node repr), laid out time-major
        # with the batch padded to 8 so the in-kernel GRU slices are aligned.
        mixed = jnp.take(params['tok_emb'], inv_tok, axis=0) + gather(reprs, inv_node)
        mixed = jnp.swapaxes(mixed, 0, 1)                            # [T, B, D]
        mixed = jnp.pad(mixed, ((0, 0), (0, Bp - B), (0, 0))).reshape(T * Bp, D)
        aa_mixed = (jnp.take(params['tok_emb'], aa_tok, axis=0)
                    + gather(reprs, aa_node)).reshape(B * A, D)

        out, inv_pad = pl.pallas_call(
            functools.partial(_encode_kernel, T=T, Bp=Bp, B=B, A=A, O=O),
            out_shape=(jax.ShapeDtypeStruct((B, A), jnp.float32),
                       jax.ShapeDtypeStruct((Bp, O), jnp.float32)),
        )(mixed, aa_mixed,
          params['inv_proj_w'], params['inv_proj_b'],
          params['gru_w_ih'], params['gru_b_ih'],
          params['gru_w_hh'], params['gru_b_hh'],
          params['act_w'], params['act_b'],
          mask.astype(jnp.float32))
        return out, inv_pad[:B]

    def forward(params, obs, graphs):
        B = obs['start'].shape[0]
        A = config['action_out_dim']
        # host-side early return, mirroring the torch data-dependent branch
        if bool(np.all(np.asarray(obs['start']).reshape(-1) == 0)):
            return (jnp.zeros((B, A), jnp.float32),
                    jnp.zeros((B, O), jnp.float32))
        # recover_graph_data + per-contract repr cache (host side, like torch).
        # TODO(synk): environment.cached_contract_utils replaced by synthetic graphs.
        contract_ids = np.asarray(obs['contract_id']).astype(np.int32)
        repr_cache = {}
        for b in range(B):        # dedup per contract id; dispatch is async
            cid = int(contract_ids[b, 0])
            if cid not in repr_cache:
                g = graphs[cid]
                repr_cache[cid] = graph_repr(params, g['x'], g['edge_attr'],
                                             g['edge_index'])
        # TODO(synk): assumes all graphs in the batch share a node count; ragged
        # graphs would need padding before stacking.
        reprs = jnp.stack([repr_cache[int(contract_ids[b, 0])] for b in range(B)], 0)
        return encode(params, reprs,
                      obs['action_seq_token'], obs['action_seq_node'],
                      obs['all_actions_token'], obs['all_actions_node'],
                      obs['action_mask'])

    return forward


# ----------------------------- init / driver -----------------------------

def _pack_linear(w_t, b):
    """Pad the output dim to a 128-lane multiple once at init, pre-cast the
    weight to bf16 (MXU operand); bias stays f32."""
    n = w_t.shape[1]
    npad = _round_up(n, 128) - n
    if npad:
        w_t = jnp.pad(w_t, ((0, 0), (0, npad)))
        b = jnp.pad(b, ((0, 0), (0, npad)))
    return w_t.astype(jnp.bfloat16), b.astype(jnp.float32)


def init_params(key, config):
    D = config['token_embedding_dim']
    V = config['num_token_embeddings']
    H = config['conv_heads']
    Hd = config['invariant_hidden_dim']
    O = config['invariant_out_dim']
    pad_idx = config['token_embedding_padding_idx']
    ks = jax.random.split(key, 20)

    def w(k, shape, scale=0.1):
        return (scale * jax.random.normal(k, shape)).astype(jnp.float32)

    tok_emb = w(ks[0], (V, D)).at[pad_idx].set(0.0)   # padding row zeroed
    wqkvs_w, wqkvs_b = _pack_linear(w(ks[1], (D, 4 * H * D)),
                                    w(ks[2], (1, 4 * H * D)))
    we_w, we_b = _pack_linear(w(ks[3], (D, H * D)),
                              jnp.zeros((1, H * D), jnp.float32))  # lin_edge: no bias
    conv1_w, conv1_b = _pack_linear(w(ks[4], (H * D, D)), w(ks[5], (1, D)))
    return {
        'tok_emb': tok_emb,
        'wqkvs_w': wqkvs_w, 'wqkvs_b': wqkvs_b,        # fused [wq|wk|wv|wskip]
        'we_w': we_w, 'we_b': we_b,
        'conv1_w': conv1_w, 'conv1_b': conv1_b,
        'inv_proj_w': w(ks[6], (D, Hd)).astype(jnp.bfloat16),
        'inv_proj_b': w(ks[7], (1, Hd)),
        'gru_w_ih': w(ks[8], (Hd, 3 * O)).astype(jnp.bfloat16),
        'gru_b_ih': w(ks[9], (1, 3 * O)),
        'gru_w_hh': w(ks[10], (O, 3 * O)),             # fused [W_hr|W_hz|W_hn]^T (f32)
        'gru_b_hh': w(ks[11], (1, 3 * O)),
        'act_w': jnp.concatenate([w(ks[12], (D, O)), w(ks[13], (D, 1))],
                                 axis=1).astype(jnp.bfloat16),     # [proj | bias]
        'act_b': jnp.concatenate([w(ks[14], (1, O)), w(ks[15], (1, 1))], axis=1),
        # TODO(synk): value_branch not exercised by forward(); omitted here.
    }


if __name__ == "__main__":
    config = dict(
        num_token_embeddings=32,
        token_embedding_dim=16,
        token_embedding_padding_idx=0,
        conv_heads=2,
        conv_dropout=0.0,
        invariant_hidden_dim=32,
        invariant_out_dim=16,
        action_out_dim=8,
    )
    B, T, N = 2, 8, 16
    A = config['action_out_dim']
    V = config['num_token_embeddings']

    params = init_params(jax.random.PRNGKey(0), config)
    forward = build_forward(config)

    rng = np.random.RandomState(0)
    graphs = []
    for gi in range(2):
        # unique directed edges: (i -> i+1) and (i -> i+3+gi) mod N
        src = np.concatenate([np.arange(N), np.arange(N)]).astype(np.int32)
        dst = np.concatenate([(np.arange(N) + 1) % N,
                              (np.arange(N) + 3 + gi) % N]).astype(np.int32)
        graphs.append({
            'x': jnp.asarray(rng.randint(1, V, size=(N,)), jnp.int32),
            'edge_attr': jnp.asarray(rng.randint(1, V, size=(src.shape[0],)), jnp.int32),
            'edge_index': jnp.asarray(np.stack([src, dst]), jnp.int32),
        })

    obs = {
        'start': jnp.ones((B, 1), jnp.float32),
        'contract_id': jnp.asarray([[0], [1]], jnp.int32),
        'action_seq_token': jnp.asarray(rng.randint(0, V, size=(B, T)), jnp.int32),
        'action_seq_node': jnp.asarray(rng.randint(0, N, size=(B, T)), jnp.int32),
        'all_actions_token': jnp.asarray(rng.randint(0, V, size=(B, A)), jnp.int32),
        'all_actions_node': jnp.asarray(rng.randint(0, N, size=(B, A)), jnp.int32),
        'action_mask': jnp.asarray(rng.binomial(1, 0.8, size=(B, A)).astype(np.float32)),
    }

    out, inv_feat = forward(params, obs, graphs)
    out = jax.block_until_ready(out)
    inv_feat = jax.block_until_ready(inv_feat)

    assert out.shape == (B, A)
    assert inv_feat.shape == (B, config['invariant_out_dim'])
    assert not np.any(np.isnan(np.asarray(out)))
    assert not np.any(np.isnan(np.asarray(inv_feat)))
    print("KERNEL_OK")
</pallas_src>

<mosaic_0001>
module attributes {stable_mosaic.version = 11 : i64} {
  func.func @_linear_kernel(%arg0: i32, %arg1: i32, %arg2: memref<16x16xbf16, #tpu.memory_space<vmem>>, %arg3: memref<16x128xbf16, #tpu.memory_space<vmem>>, %arg4: memref<1x128xf32, #tpu.memory_space<vmem>>, %arg5: memref<16x128xf32, #tpu.memory_space<vmem>>) attributes {dimension_semantics = [#tpu.dimension_semantics<parallel>, #tpu.dimension_semantics<parallel>], iteration_bounds = array<i64: 1, 1>, scalar_prefetch = 0 : i64, scratch_operands = 0 : i64, tpu.core_type = #tpu.core_type<tc>, window_params = [{transform_indices = @transform_0, window_bounds = array<i64: 16, 16>}, {transform_indices = @transform_1, window_bounds = array<i64: 16, 128>}, {transform_indices = @transform_2, window_bounds = array<i64: 1, 128>}, {transform_indices = @transform_3, window_bounds = array<i64: 16, 128>}]} {
    %c0 = arith.constant 0 : index
    %c0_0 = arith.constant 0 : index
    %0 = vector.load %arg2[%c0, %c0_0] : memref<16x16xbf16, #tpu.memory_space<vmem>>, vector<16x16xbf16>
    %c0_1 = arith.constant 0 : index
    %c0_2 = arith.constant 0 : index
    %1 = vector.load %arg3[%c0_1, %c0_2] : memref<16x128xbf16, #tpu.memory_space<vmem>>, vector<16x128xbf16>
    %cst = arith.constant dense<0.000000e+00> : vector<16x128xf32>
    %2 = tpu.matmul %0, %1, %cst {dimension_numbers = #tpu.dot_dimension_numbers<[1], [0], [0], [1], [0, 0, 1, 1], [], []>} : vector<16x16xbf16>, vector<16x128xbf16>, vector<16x128xf32> -> vector<16x128xf32>
    %c0_3 = arith.constant 0 : index
    %c0_4 = arith.constant 0 : index
    %3 = vector.load %arg4[%c0_3, %c0_4] : memref<1x128xf32, #tpu.memory_space<vmem>>, vector<1x128xf32>
    %4 = vector.broadcast %3 : vector<1x128xf32> to vector<16x128xf32>
    %5 = arith.addf %2, %4 : vector<16x128xf32>
    %c0_5 = arith.constant 0 : index
    %c0_6 = arith.constant 0 : index
    %6 = vector.load %arg5[%c0_5, %c0_6] : memref<16x128xf32, #tpu.memory_space<vmem>>, vector<16x128xf32>
    tpu.vector_store %arg5[%c0_5, %c0_6], %5 {strides = array<i32>} : memref<16x128xf32, #tpu.memory_space<vmem>>, vector<16x128xf32>,
    return
  }
  func.func @transform_0(%arg0: i32, %arg1: i32) -> (i32, i32) {
    %c0_i32 = arith.constant 0 : i32
    %c0_i32_0 = arith.constant 0 : i32
    return %arg1, %c0_i32 : i32, i32
  }
  func.func @transform_1(%arg0: i32, %arg1: i32) -> (i32, i32) {
    %c0_i32 = arith.constant 0 : i32
    %c0_i32_0 = arith.constant 0 : i32
    return %c0_i32, %arg0 : i32, i32
  }
  func.func @transform_2(%arg0: i32, %arg1: i32) -> (i32, i32) {
    %c0_i32 = arith.constant 0 : i32
    %c0_i32_0 = arith.constant 0 : i32
    return %c0_i32, %arg0 : i32, i32
  }
  func.func @transform_3(%arg0: i32, %arg1: i32) -> (i32, i32) {
    %c0_i32 = arith.constant 0 : i32
    return %arg1, %arg0 : i32, i32
  }
}

module attributes {stable_mosaic.version = 11 : i64} {
  func.func @_linear_kernel(%arg0: i32, %arg1: i32, %arg2: memref<32x16xbf16, #tpu.memory_space<vmem>>, %arg3: memref<16x128xbf16, #tpu.memory_space<vmem>>, %arg4: memref<1x128xf32, #tpu.memory_space<vmem>>, %arg5: memref<32x128xf32, #tpu.memory_space<vmem>>) attributes {dimension_semantics = [#tpu.dimension_semantics<parallel>, #tpu.dimension_semantics<parallel>], iteration_bounds = array<i64: 1, 1>, scalar_prefetch = 0 : i64, scratch_operands = 0 : i64, tpu.core_type = #tpu.core_type<tc>, window_params = [{transform_indices = @transform_0, window_bounds = array<i64: 32, 16>}, {transform_indices = @transform_1, window_bounds = array<i64: 16, 128>}, {transform_indices = @transform_2, window_bounds = array<i64: 1, 128>}, {transform_indices = @transform_3, window_bounds = array<i64: 32, 128>}]} {
    %c0 = arith.constant 0 : index
    %c0_0 = arith.constant 0 : index
    %0 = vector.load %arg2[%c0, %c0_0] : memref<32x16xbf16, #tpu.memory_space<vmem>>, vector<32x16xbf16>
    %c0_1 = arith.constant 0 : index
    %c0_2 = arith.constant 0 : index
    %1 = vector.load %arg3[%c0_1, %c0_2] : memref<16x128xbf16, #tpu.memory_space<vmem>>, vector<16x128xbf16>
    %cst = arith.constant dense<0.000000e+00> : vector<32x128xf32>
    %2 = tpu.matmul %0, %1, %cst {dimension_numbers = #tpu.dot_dimension_numbers<[1], [0], [0], [1], [0, 0, 1, 1], [], []>} : vector<32x16xbf16>, vector<16x128xbf16>, vector<32x128xf32> -> vector<32x128xf32>
    %c0_3 = arith.constant 0 : index
    %c0_4 = arith.constant 0 : index
    %3 = vector.load %arg4[%c0_3, %c0_4] : memref<1x128xf32, #tpu.memory_space<vmem>>, vector<1x128xf32>
    %4 = vector.broadcast %3 : vector<1x128xf32> to vector<32x128xf32>
    %5 = arith.addf %2, %4 : vector<32x128xf32>
    %c0_5 = arith.constant 0 : index
    %c0_6 = arith.constant 0 : index
    %6 = vector.load %arg5[%c0_5, %c0_6] : memref<32x128xf32, #tpu.memory_space<vmem>>, vector<32x128xf32>
    tpu.vector_store %arg5[%c0_5, %c0_6], %5 {strides = array<i32>} : memref<32x128xf32, #tpu.memory_space<vmem>>, vector<32x128xf32>,
    return
  }
  func.func @transform_0(%arg0: i32, %arg1: i32) -> (i32, i32) {
    %c0_i32 = arith.constant 0 : i32
    %c0_i32_0 = arith.constant 0 : i32
    return %arg1, %c0_i32 : i32, i32
  }
  func.func @transform_1(%arg0: i32, %arg1: i32) -> (i32, i32) {
    %c0_i32 = arith.constant 0 : i32
    %c0_i32_0 = arith.constant 0 : i32
    return %c0_i32, %arg0 : i32, i32
  }
  func.func @transform_2(%arg0: i32, %arg1: i32) -> (i32, i32) {
    %c0_i32 = arith.constant 0 : i32
    %c0_i32_0 = arith.constant 0 : i32
    return %c0_i32, %arg0 : i32, i32
  }
  func.func @transform_3(%arg0: i32, %arg1: i32) -> (i32, i32) {
    %c0_i32 = arith.constant 0 : i32
    return %arg1, %arg0 : i32, i32
  }
}

module attributes {stable_mosaic.version = 11 : i64} {
  func.func @_conv_attn_kernel(%arg0: i32, %arg1: memref<2x16x16xf32, #tpu.memory_space<vmem>>, %arg2: memref<2x16x16xf32, #tpu.memory_space<vmem>>, %arg3: memref<2x16x16xf32, #tpu.memory_space<vmem>>, %arg4: memref<2x16x16xf32, #tpu.memory_space<vmem>>, %arg5: memref<2x32x16xf32, #tpu.memory_space<vmem>>, %arg6: memref<16x32xbf16, #tpu.memory_space<vmem>>, %arg7: memref<16x32xbf16, #tpu.memory_space<vmem>>, %arg8: memref<32x128xbf16, #tpu.memory_space<vmem>>, %arg9: memref<1x128xf32, #tpu.memory_space<vmem>>, %arg10: memref<16x128xf32, #tpu.memory_space<vmem>>) attributes {dimension_semantics = [#tpu.dimension_semantics<parallel>], iteration_bounds = array<i64: 1>, scalar_prefetch = 0 : i64, scratch_operands = 0 : i64, tpu.core_type = #tpu.core_type<tc>, window_params = [{transform_indices = @transform_0, window_bounds = array<i64: 2, 16, 16>}, {pipeline_mode = #tpu.pipeline_mode<synchronous>, transform_indices = @transform_1, window_bounds = array<i64: 2, 16, 16>}, {pipeline_mode = #tpu.pipeline_mode<synchronous>, transform_indices = @transform_2, window_bounds = array<i64: 2, 16, 16>}, {transform_indices = @transform_3, window_bounds = array<i64: 2, 16, 16>}, {pipeline_mode = #tpu.pipeline_mode<synchronous>, transform_indices = @transform_4, window_bounds = array<i64: 2, 32, 16>}, {pipeline_mode = #tpu.pipeline_mode<synchronous>, transform_indices = @transform_5, window_bounds = array<i64: 16, 32>}, {transform_indices = @transform_6, window_bounds = array<i64: 16, 32>}, {pipeline_mode = #tpu.pipeline_mode<synchronous>, transform_indices = @transform_7, window_bounds = array<i64: 32, 128>}, {pipeline_mode = #tpu.pipeline_mode<synchronous>, transform_indices = @transform_8, window_bounds = array<i64: 1, 128>}, {transform_indices = @transform_9, window_bounds = array<i64: 16, 128>}]} {
    %c0 = arith.constant 0 : index
    %c0_0 = arith.constant 0 : index
    %0 = vector.load %arg6[%c0, %c0_0] : memref<16x32xbf16, #tpu.memory_space<vmem>>, vector<16x32xbf16>
    %c0_1 = arith.constant 0 : index
    %c0_2 = arith.constant 0 : index
    %1 = vector.load %arg7[%c0_1, %c0_2] : memref<16x32xbf16, #tpu.memory_space<vmem>>, vector<16x32xbf16>
    %2 = arith.extf %1 : vector<16x32xbf16> to vector<16x32xf32>
    %cst = arith.constant dense<0.000000e+00> : vector<16x16xf32>
    %3 = tpu.matmul %1, %0, %cst {dimension_numbers = #tpu.dot_dimension_numbers<[1], [1], [0], [0], [0, 0, 1, 0], [], []>} : vector<16x32xbf16>, vector<16x32xbf16>, vector<16x16xf32> -> vector<16x16xf32>
    %cst_3 = arith.constant 5.000000e-01 : f32
    %4 = vector.broadcast %cst_3 : f32 to vector<16x16xf32>
    %5 = arith.cmpf ogt, %3, %4 : vector<16x16xf32>
    %6 = arith.extui %5 : vector<16x16xi1> to vector<16x16xi32>
    %7 = arith.sitofp %6 : vector<16x16xi32> to vector<16x16xf32>
    %c0_4 = arith.constant 0 : index
    %c0_5 = arith.constant 0 : index
    %c0_6 = arith.constant 0 : index
    %8 = vector.load %arg1[%c0_4, %c0_5, %c0_6] : memref<2x16x16xf32, #tpu.memory_space<vmem>>, vector<1x16x16xf32>
    %9 = vector.shape_cast %8 : vector<1x16x16xf32> to vector<16x16xf32>
    %10 = arith.truncf %9 : vector<16x16xf32> to vector<16x16xbf16>
    %c0_7 = arith.constant 0 : index
    %c0_8 = arith.constant 0 : index
    %c0_9 = arith.constant 0 : index
    %11 = vector.load %arg2[%c0_7, %c0_8, %c0_9] : memref<2x16x16xf32, #tpu.memory_space<vmem>>, vector<1x16x16xf32>
    %12 = vector.shape_cast %11 : vector<1x16x16xf32> to vector<16x16xf32>
    %13 = arith.truncf %12 : vector<16x16xf32> to vector<16x16xbf16>
    %c0_10 = arith.constant 0 : index
    %c0_11 = arith.constant 0 : index
    %c0_12 = arith.constant 0 : index
    %14 = vector.load %arg3[%c0_10, %c0_11, %c0_12] : memref<2x16x16xf32, #tpu.memory_space<vmem>>, vector<1x16x16xf32>
    %15 = vector.shape_cast %14 : vector<1x16x16xf32> to vector<16x16xf32>
    %16 = arith.truncf %15 : vector<16x16xf32> to vector<16x16xbf16>
    %c0_13 = arith.constant 0 : index
    %c0_14 = arith.constant 0 : index
    %c0_15 = arith.constant 0 : index
    %17 = vector.load %arg5[%c0_13, %c0_14, %c0_15] : memref<2x32x16xf32, #tpu.memory_space<vmem>>, vector<1x32x16xf32>
    %18 = vector.shape_cast %17 : vector<1x32x16xf32> to vector<32x16xf32>
    %19 = arith.truncf %18 : vector<32x16xf32> to vector<32x16xbf16>
    %cst_16 = arith.constant dense<0.000000e+00> : vector<16x16xf32>
    %20 = tpu.matmul %10, %13, %cst_16 {dimension_numbers = #tpu.dot_dimension_numbers<[1], [1], [0], [0], [0, 0, 1, 0], [], []>} : vector<16x16xbf16>, vector<16x16xbf16>, vector<16x16xf32> -> vector<16x16xf32>
    %cst_17 = arith.constant dense<0.000000e+00> : vector<16x32xf32>
    %21 = tpu.matmul %10, %19, %cst_17 {dimension_numbers = #tpu.dot_dimension_numbers<[1], [1], [0], [0], [0, 0, 1, 0], [], []>} : vector<16x16xbf16>, vector<32x16xbf16>, vector<16x32xf32> -> vector<16x32xf32>
    %22 = arith.mulf %21, %2 : vector<16x32xf32>
    %23 = arith.truncf %22 : vector<16x32xf32> to vector<16x32xbf16>
    %cst_18 = arith.constant dense<0.000000e+00> : vector<16x16xf32>
    %24 = tpu.matmul %23, %0, %cst_18 {dimension_numbers = #tpu.dot_dimension_numbers<[1], [1], [0], [0], [0, 0, 1, 0], [], []>} : vector<16x32xbf16>, vector<16x32xbf16>, vector<16x16xf32> -> vector<16x16xf32>
    %25 = arith.addf %20, %24 : vector<16x16xf32>
    %cst_19 = arith.constant 2.500000e-01 : f32
    %26 = vector.broadcast %cst_19 : f32 to vector<16x16xf32>
    %27 = arith.mulf %25, %26 : vector<16x16xf32>
    %cst_20 = arith.constant -1.000000e+30 : f32
    %28 = vector.broadcast %cst_20 : f32 to vector<16x16xf32>
    %29 = arith.select %5, %27, %28 : vector<16x16xi1>, vector<16x16xf32>
    %cst_21 = arith.constant dense<0xFF800000> : vector<16xf32>
    %30 = vector.multi_reduction <maximumf>, %29, %cst_21 [1] : vector<16x16xf32> to vector<16xf32>
    %31 = vector.shape_cast %30 : vector<16xf32> to vector<16x1xf32>
    %32 = vector.broadcast %31 : vector<16x1xf32> to vector<16x16xf32>
    %33 = arith.subf %29, %32 : vector<16x16xf32>
    %34 = math.exp %33 : vector<16x16xf32>
    %35 = arith.mulf %34, %7 : vector<16x16xf32>
    %cst_22 = arith.constant dense<0.000000e+00> : vector<16xf32>
    %36 = vector.multi_reduction <add>, %35, %cst_22 [1] : vector<16x16xf32> to vector<16xf32>
    %37 = vector.shape_cast %36 : vector<16xf32> to vector<16x1xf32>
    %cst_23 = arith.constant 1.000000e-30 : f32
    %38 = vector.broadcast %cst_23 : f32 to vector<16x1xf32>
    %39 = arith.maximumf %37, %38 : vector<16x1xf32>
    %40 = vector.broadcast %39 : vector<16x1xf32> to vector<16x16xf32>
    %41 = arith.divf %35, %40 : vector<16x16xf32>
    %42 = arith.truncf %41 : vector<16x16xf32> to vector<16x16xbf16>
    %cst_24 = arith.constant dense<0.000000e+00> : vector<16x16xf32>
    %43 = tpu.matmul %42, %16, %cst_24 {dimension_numbers = #tpu.dot_dimension_numbers<[1], [0], [0], [1], [0, 0, 1, 1], [], []>} : vector<16x16xbf16>, vector<16x16xbf16>, vector<16x16xf32> -> vector<16x16xf32>
    %cst_25 = arith.constant dense<0.000000e+00> : vector<16x32xf32>
    %44 = tpu.matmul %42, %0, %cst_25 {dimension_numbers = #tpu.dot_dimension_numbers<[1], [0], [0], [1], [0, 0, 1, 1], [], []>} : vector<16x16xbf16>, vector<16x32xbf16>, vector<16x32xf32> -> vector<16x32xf32>
    %45 = arith.mulf %44, %2 : vector<16x32xf32>
    %46 = arith.truncf %45 : vector<16x32xf32> to vector<16x32xbf16>
    %cst_26 = arith.constant dense<0.000000e+00> : vector<16x16xf32>
    %47 = tpu.matmul %46, %19, %cst_26 {dimension_numbers = #tpu.dot_dimension_numbers<[1], [0], [0], [1], [0, 0, 1, 1], [], []>} : vector<16x32xbf16>, vector<32x16xbf16>, vector<16x16xf32> -> vector<16x16xf32>
    %48 = arith.addf %43, %47 : vector<16x16xf32>
    %c0_27 = arith.constant 0 : index
    %c0_28 = arith.constant 0 : index
    %c0_29 = arith.constant 0 : index
    %49 = vector.load %arg4[%c0_27, %c0_28, %c0_29] : memref<2x16x16xf32, #tpu.memory_space<vmem>>, vector<1x16x16xf32>
    %50 = vector.shape_cast %49 : vector<1x16x16xf32> to vector<16x16xf32>
    %51 = arith.addf %48, %50 : vector<16x16xf32>
    %c1 = arith.constant 1 : index
    %c0_30 = arith.constant 0 : index
    %c0_31 = arith.constant 0 : index
    %52 = vector.load %arg1[%c1, %c0_30, %c0_31] : memref<2x16x16xf32, #tpu.memory_space<vmem>>, vector<1x16x16xf32>
    %53 = vector.shape_cast %52 : vector<1x16x16xf32> to vector<16x16xf32>
    %54 = arith.truncf %53 : vector<16x16xf32> to vector<16x16xbf16>
    %c1_32 = arith.constant 1 : index
    %c0_33 = arith.constant 0 : index
    %c0_34 = arith.constant 0 : index
    %55 = vector.load %arg2[%c1_32, %c0_33, %c0_34] : memref<2x16x16xf32, #tpu.memory_space<vmem>>, vector<1x16x16xf32>
    %56 = vector.shape_cast %55 : vector<1x16x16xf32> to vector<16x16xf32>
    %57 = arith.truncf %56 : vector<16x16xf32> to vector<16x16xbf16>
    %c1_35 = arith.constant 1 : index
    %c0_36 = arith.constant 0 : index
    %c0_37 = arith.constant 0 : index
    %58 = vector.load %arg3[%c1_35, %c0_36, %c0_37] : memref<2x16x16xf32, #tpu.memory_space<vmem>>, vector<1x16x16xf32>
    %59 = vector.shape_cast %58 : vector<1x16x16xf32> to vector<16x16xf32>
    %60 = arith.truncf %59 : vector<16x16xf32> to vector<16x16xbf16>
    %c1_38 = arith.constant 1 : index
    %c0_39 = arith.constant 0 : index
    %c0_40 = arith.constant 0 : index
    %61 = vector.load %arg5[%c1_38, %c0_39, %c0_40] : memref<2x32x16xf32, #tpu.memory_space<vmem>>, vector<1x32x16xf32>
    %62 = vector.shape_cast %61 : vector<1x32x16xf32> to vector<32x16xf32>
    %63 = arith.truncf %62 : vector<32x16xf32> to vector<32x16xbf16>
    %cst_41 = arith.constant dense<0.000000e+00> : vector<16x16xf32>
    %64 = tpu.matmul %54, %57, %cst_41 {dimension_numbers = #tpu.dot_dimension_numbers<[1], [1], [0], [0], [0, 0, 1, 0], [], []>} : vector<16x16xbf16>, vector<16x16xbf16>, vector<16x16xf32> -> vector<16x16xf32>
    %cst_42 = arith.constant dense<0.000000e+00> : vector<16x32xf32>
    %65 = tpu.matmul %54, %63, %cst_42 {dimension_numbers = #tpu.dot_dimension_numbers<[1], [1], [0], [0], [0, 0, 1, 0], [], []>} : vector<16x16xbf16>, vector<32x16xbf16>, vector<16x32xf32> -> vector<16x32xf32>
    %66 = arith.mulf %65, %2 : vector<16x32xf32>
    %67 = arith.truncf %66 : vector<16x32xf32> to vector<16x32xbf16>
    %cst_43 = arith.constant dense<0.000000e+00> : vector<16x16xf32>
    %68 = tpu.matmul %67, %0, %cst_43 {dimension_numbers = #tpu.dot_dimension_numbers<[1], [1], [0], [0], [0, 0, 1, 0], [], []>} : vector<16x32xbf16>, vector<16x32xbf16>, vector<16x16xf32> -> vector<16x16xf32>
    %69 = arith.addf %64, %68 : vector<16x16xf32>
    %cst_44 = arith.constant 2.500000e-01 : f32
    %70 = vector.broadcast %cst_44 : f32 to vector<16x16xf32>
    %71 = arith.mulf %69, %70 : vector<16x16xf32>
    %cst_45 = arith.constant -1.000000e+30 : f32
    %72 = vector.broadcast %cst_45 : f32 to vector<16x16xf32>
    %73 = arith.select %5, %71, %72 : vector<16x16xi1>, vector<16x16xf32>
    %cst_46 = arith.constant dense<0xFF800000> : vector<16xf32>
    %74 = vector.multi_reduction <maximumf>, %73, %cst_46 [1] : vector<16x16xf32> to vector<16xf32>
    %75 = vector.shape_cast %74 : vector<16xf32> to vector<16x1xf32>
    %76 = vector.broadcast %75 : vector<16x1xf32> to vector<16x16xf32>
    %77 = arith.subf %73, %76 : vector<16x16xf32>
    %78 = math.exp %77 : vector<16x16xf32>
    %79 = arith.mulf %78, %7 : vector<16x16xf32>
    %cst_47 = arith.constant dense<0.000000e+00> : vector<16xf32>
    %80 = vector.multi_reduction <add>, %79, %cst_47 [1] : vector<16x16xf32> to vector<16xf32>
    %81 = vector.shape_cast %80 : vector<16xf32> to vector<16x1xf32>
    %cst_48 = arith.constant 1.000000e-30 : f32
    %82 = vector.broadcast %cst_48 : f32 to vector<16x1xf32>
    %83 = arith.maximumf %81, %82 : vector<16x1xf32>
    %84 = vector.broadcast %83 : vector<16x1xf32> to vector<16x16xf32>
    %85 = arith.divf %79, %84 : vector<16x16xf32>
    %86 = arith.truncf %85 : vector<16x16xf32> to vector<16x16xbf16>
    %cst_49 = arith.constant dense<0.000000e+00> : vector<16x16xf32>
    %87 = tpu.matmul %86, %60, %cst_49 {dimension_numbers = #tpu.dot_dimension_numbers<[1], [0], [0], [1], [0, 0, 1, 1], [], []>} : vector<16x16xbf16>, vector<16x16xbf16>, vector<16x16xf32> -> vector<16x16xf32>
    %cst_50 = arith.constant dense<0.000000e+00> : vector<16x32xf32>
    %88 = tpu.matmul %86, %0, %cst_50 {dimension_numbers = #tpu.dot_dimension_numbers<[1], [0], [0], [1], [0, 0, 1, 1], [], []>} : vector<16x16xbf16>, vector<16x32xbf16>, vector<16x32xf32> -> vector<16x32xf32>
    %89 = arith.mulf %88, %2 : vector<16x32xf32>
    %90 = arith.truncf %89 : vector<16x32xf32> to vector<16x32xbf16>
    %cst_51 = arith.constant dense<0.000000e+00> : vector<16x16xf32>
    %91 = tpu.matmul %90, %63, %cst_51 {dimension_numbers = #tpu.dot_dimension_numbers<[1], [0], [0], [1], [0, 0, 1, 1], [], []>} : vector<16x32xbf16>, vector<32x16xbf16>, vector<16x16xf32> -> vector<16x16xf32>
    %92 = arith.addf %87, %91 : vector<16x16xf32>
    %c1_52 = arith.constant 1 : index
    %c0_53 = arith.constant 0 : index
    %c0_54 = arith.constant 0 : index
    %93 = vector.load %arg4[%c1_52, %c0_53, %c0_54] : memref<2x16x16xf32, #tpu.memory_space<vmem>>, vector<1x16x16xf32>
    %94 = vector.shape_cast %93 : vector<1x16x16xf32> to vector<16x16xf32>
    %95 = arith.addf %92, %94 : vector<16x16xf32>
    %96 = tpu.concatenate %51, %95 in 1 : vector<16x16xf32>, vector<16x16xf32> -> vector<16x32xf32>
    %cst_55 = arith.constant 0.000000e+00 : f32
    %97 = vector.broadcast %cst_55 : f32 to vector<16x32xf32>
    %98 = arith.maximumf %96, %97 : vector<16x32xf32>
    %99 = arith.truncf %98 : vector<16x32xf32> to vector<16x32xbf16>
    %c0_56 = arith.constant 0 : index
    %c0_57 = arith.constant 0 : index
    %100 = vector.load %arg8[%c0_56, %c0_57] : memref<32x128xbf16, #tpu.memory_space<vmem>>, vector<32x128xbf16>
    %cst_58 = arith.constant dense<0.000000e+00> : vector<16x128xf32>
    %101 = tpu.matmul %99, %100, %cst_58 {dimension_numbers = #tpu.dot_dimension_numbers<[1], [0], [0], [1], [0, 0, 1, 1], [], []>} : vector<16x32xbf16>, vector<32x128xbf16>, vector<16x128xf32> -> vector<16x128xf32>
    %c0_59 = arith.constant 0 : index
    %c0_60 = arith.constant 0 : index
    %102 = vector.load %arg9[%c0_59, %c0_60] : memref<1x128xf32, #tpu.memory_space<vmem>>, vector<1x128xf32>
    %103 = vector.broadcast %102 : vector<1x128xf32> to vector<16x128xf32>
    %104 = arith.addf %101, %103 : vector<16x128xf32>
    %cst_61 = arith.constant 0.000000e+00 : f32
    %105 = vector.broadcast %cst_61 : f32 to vector<16x128xf32>
    %106 = arith.maximumf %104, %105 : vector<16x128xf32>
    %c0_62 = arith.constant 0 : index
    %c0_63 = arith.constant 0 : index
    %107 = vector.load %arg10[%c0_62, %c0_63] : memref<16x128xf32, #tpu.memory_space<vmem>>, vector<16x128xf32>
    tpu.vector_store %arg10[%c0_62, %c0_63], %106 {strides = array<i32>} : memref<16x128xf32, #tpu.memory_space<vmem>>, vector<16x128xf32>,
    return
  }
  func.func @transform_0(%arg0: i32) -> (i32, i32, i32) {
    %c0_i32 = arith.constant 0 : i32
    %c0_i32_0 = arith.constant 0 : i32
    %c0_i32_1 = arith.constant 0 : i32
    return %c0_i32, %arg0, %c0_i32_0 : i32, i32, i32
  }
  func.func @transform_1(%arg0: i32) -> (i32, i32, i32) {
    %c0_i32 = arith.constant 0 : i32
    %c0_i32_0 = arith.constant 0 : i32
    %c0_i32_1 = arith.constant 0 : i32
    %c0_i32_2 = arith.constant 0 : i32
    return %c0_i32, %c0_i32_0, %c0_i32_1 : i32, i32, i32
  }
  func.func @transform_2(%arg0: i32) -> (i32, i32, i32) {
    %c0_i32 = arith.constant 0 : i32
    %c0_i32_0 = arith.constant 0 : i32
    %c0_i32_1 = arith.constant 0 : i32
    %c0_i32_2 = arith.constant 0 : i32
    return %c0_i32, %c0_i32_0, %c0_i32_1 : i32, i32, i32
  }
  func.func @transform_3(%arg0: i32) -> (i32, i32, i32) {
    %c0_i32 = arith.constant 0 : i32
    %c0_i32_0 = arith.constant 0 : i32
    %c0_i32_1 = arith.constant 0 : i32
    return %c0_i32, %arg0, %c0_i32_0 : i32, i32, i32
  }
  func.func @transform_4(%arg0: i32) -> (i32, i32, i32) {
    %c0_i32 = arith.constant 0 : i32
    %c0_i32_0 = arith.constant 0 : i32
    %c0_i32_1 = arith.constant 0 : i32
    %c0_i32_2 = arith.constant 0 : i32
    return %c0_i32, %c0_i32_0, %c0_i32_1 : i32, i32, i32
  }
  func.func @transform_5(%arg0: i32) -> (i32, i32) {
    %c0_i32 = arith.constant 0 : i32
    %c0_i32_0 = arith.constant 0 : i32
    %c0_i32_1 = arith.constant 0 : i32
    return %c0_i32, %c0_i32_0 : i32, i32
  }
  func.func @transform_6(%arg0: i32) -> (i32, i32) {
    %c0_i32 = arith.constant 0 : i32
    %c0_i32_0 = arith.constant 0 : i32
    return %arg0, %c0_i32 : i32, i32
  }
  func.func @transform_7(%arg0: i32) -> (i32, i32) {
    %c0_i32 = arith.constant 0 : i32
    %c0_i32_0 = arith.constant 0 : i32
    %c0_i32_1 = arith.constant 0 : i32
    return %c0_i32, %c0_i32_0 : i32, i32
  }
  func.func @transform_8(%arg0: i32) -> (i32, i32) {
    %c0_i32 = arith.constant 0 : i32
    %c0_i32_0 = arith.constant 0 : i32
    %c0_i32_1 = arith.constant 0 : i32
    return %c0_i32, %c0_i32_0 : i32, i32
  }
  func.func @transform_9(%arg0: i32) -> (i32, i32) {
    %c0_i32 = arith.constant 0 : i32
    %c0_i32_0 = arith.constant 0 : i32
    return %arg0, %c0_i32 : i32, i32
  }
}

</mosaic_0001>

<bundles_post_ra>
// kernel: graph_repr.4
= control target key start
LH: loop header
LB: loop body
LE: loop exit
PB: predicated region body
PF: predicated region fallthrough
CT: control target
= control target key end

     0   :  { %vm44_vm0 = vcmask 130048   ;;  %s170_s1 = inlined_call_operand.vmem [shape: bf16[16,128], index: 1, kind: input, shape index: {}]   ;;  %s171_s0 = inlined_call_operand.vmem [shape: bf16[32,16], index: 0, kind: input, shape index: {}]   ;;  %s172_s2 = inlined_call_operand.vmem [shape: f32[1,128], index: 2, kind: input, shape index: {}]   ;;  %s173_s3 = inlined_call_operand.vmem [shape: f32[32,128], index: 3, kind: output, shape index: {}]  }
   0x1   :  { %v123_v0 = vld [vmem:[%s170_s1] sm:$0xff]   ;;  %v125_v2 = vld [vmem:[%s171_s0 + $0x8] sm:$0xff]  }
   0x2   :  { %v124_v1 = vld [vmem:[%s171_s0] sm:$0xff]   ;;  %117 = vmatprep.subr.bf16.mxu0 %v123_v0 }
   0x3   :  { %118 = vmatpush3.bf16.msra.mxu0 %v123_v0  ;;  %119 = vmatprep.mubr.msk.bf16.mxu0 %vm44_vm0, %v124_v1  ;;  %v108_v3 = vld [vmem:[%s172_s2] ss:$0 sm:$0xff] }
   0x6   :  { %120 = vmatmul.mubr.msk.bf16.vlgmr.msra.gmra.mxu0 %vm44_vm0, %v125_v2 }
  0xc6   :  { %v121_v4 = vpop.f32.mrf.mxu0 }
  0xc7   :  { %v94_v5 = vadd.f32 %v121_v4, %v108_v3 }
  0xc8   :  { %v85_v6 = vpop.f32.mrf.mxu0 }
  0xc9   :  { %102 = vst [vmem:[%s173_s3 + $0x10] sm:$0xff] %v94_v5  ;;  %v86_v7 = vadd.f32 %v108_v3, %v85_v6 }
  0xca   :  { %v122_v8 = vpop.f32.mrf.mxu0 }
  0xcb   :  { %100 = vst [vmem:[%s173_s3] sm:$0xff] %v86_v7  ;;  %v97_v9 = vadd.f32 %v122_v8, %v108_v3 }
  0xcc   :  { %v88_v10 = vpop.f32.mrf.mxu0 }
  0xcd   :  { %103 = vst [vmem:[%s173_s3 + $0x18] sm:$0xff] %v97_v9  ;;  %v89_v11 = vadd.f32 %v108_v3, %v88_v10 }
  0xcf   :  { %101 = vst [vmem:[%s173_s3 + $0x8] sm:$0xff] %v89_v11 }

// kernel: graph_repr.3
= control target key start
LH: loop header
LB: loop body
LE: loop exit
PB: predicated region body
PF: predicated region fallthrough
CT: control target
= control target key end

     0   :  { %v104_v0 = vmov 0.0   ;;  %vm105_vm0 = vmmov 0   ;;  %vm37_vm1 = vcmask 130048   ;;  %s141_s1 = inlined_call_operand.vmem [shape: bf16[16,128], index: 1, kind: input, shape index: {}]   ;;  %s142_s0 = inlined_call_operand.vmem [shape: bf16[16,16], index: 0, kind: input, shape index: {}]   ;;  %s143_s2 = inlined_call_operand.vmem [shape: f32[1,128], index: 2, kind: input, shape index: {}]   ;;  %s144_s3 = inlined_call_operand.vmem [shape: f32[16,128], index: 3, kind: output, shape index: {}]  }
   0x1   :  { %94 = vmatprep.subr.bf16.mxu0 %v104_v0  ;;  %v102_v1 = vld [vmem:[%s141_s1] sm:$0xff]   ;;  %96 = vmatprep.mubr.msk.bf16.mxu0 %vm105_vm0, %v104_v0 }
   0x2   :  { %v103_v2 = vld [vmem:[%s142_s0] sm:$0xff]   ;;  %95 = vmatpush3.bf16.msra.mxu0 %v102_v1 }
   0x3   :  { %v88_v3 = vld [vmem:[%s143_s2] ss:$0 sm:$0xff] }
   0x5   :  { %97 = vmatmul.mubr.msk.bf16.vlgmr.msra.gmra.mxu0 %vm37_vm1, %v103_v2 }
  0xc5   :  { %v75_v4 = vpop.f32.mrf.mxu0 }
  0xc6   :  { %v76_v5 = vadd.f32 %v88_v3, %v75_v4 }
  0xc7   :  { %v98_v6 = vpop.f32.mrf.mxu0 }
  0xc8   :  { %82 = vst [vmem:[%s144_s3] sm:$0xff] %v76_v5 }
  0xc9   :  { %v78_v7 = vpop.f32.mrf.mxu0 }
  0xca   :  { %v79_v8 = vadd.f32 %v88_v3, %v78_v7 }
  0xcb   :  { %v99_v9 = vpop.f32.mrf.mxu0 }
  0xcc   :  { %83 = vst [vmem:[%s144_s3 + $0x8] sm:$0xff] %v79_v8 }

// kernel: graph_repr.5
= control target key start
LH: loop header
LB: loop body
LE: loop exit
PB: predicated region body
PF: predicated region fallthrough
CT: control target
= control target key end

     0   :  { %vm119_vm0 = vcmask 130048   ;;  %v1071_v2 = vmov 0.0   ;;  %vm1072_vm1 = vmmov 0   ;;  %vm50_vm2 = vcmask 261120   ;;  %s1357_s0 = inlined_call_operand.vmem [shape: f32[2,16,16], index: 0, kind: input, shape index: {}]   ;;  %s1358_s1 = inlined_call_operand.vmem [shape: f32[2,16,16], index: 1, kind: input, shape index: {}]   ;;  %s1359_s2 = inlined_call_operand.vmem [shape: f32[2,16,16], index: 2, kind: input, shape index: {}]   ;;  %s1360_s3 = inlined_call_operand.vmem [shape: f32[2,16,16], index: 3, kind: input, shape index: {}]   ;;  %s1361_s4 = inlined_call_operand.vmem [shape: f32[2,32,16], index: 4, kind: input, shape index: {}]   ;;  %s1362_s5 = inlined_call_operand.vmem [shape: bf16[16,32], index: 5, kind: input, shape index: {}]   ;;  %s1363_s6 = inlined_call_operand.vmem [shape: bf16[16,32], index: 6, kind: input, shape index: {}]   ;;  %s1364_s7 = inlined_call_operand.vmem [shape: bf16[32,128], index: 7, kind: input, shape index: {}]   ;;  %s1365_s8 = inlined_call_operand.vmem [shape: f32[1,128], index: 8, kind: input, shape index: {}]   ;;  %s1366_s9 = inlined_call_operand.hbm [shape: f32[16,128], index: 9, kind: output, shape index: {}]  }
   0x1   :  { %v115_v0 = vld [vmem:[%s1361_s4 + $0x10] sm:$0xff]  ;;  %v116_v1 = vld [vmem:[%s1361_s4 + $0x18] sm:$0xff]  ;;  %929 = vmatprep.subr.bf16.mxu1 %v1071_v2  ;;  %v113_v4 = vld [vmem:[%s1361_s4] sm:$0xff]  ;;  %933 = vmatprep.mubr.msk.bf16.mxu1 %vm1072_vm1, %v1071_v2 }
   0x2   :  { %v118_v3 = vpack.c.bf16 %v116_v1, %v115_v0  ;;  %v114_v5 = vld [vmem:[%s1361_s4 + $0x8] sm:$0xff]  ;;  %923 = vmatprep.subr.bf16.mxu0 %v1071_v2  ;;  %v1146_v6 = vld [vmem:[%s1362_s5] sm:$0xff]   ;;  %925 = vmatprep.mubr.msk.bf16.mxu0 %vm1072_vm1, %v1071_v2 }
   0x3   :  { %v1153_v8 = vsel %vm50_vm2, %v1146_v6, 0  ;;  %v117_v9 = vpack.c.bf16 %v114_v5, %v113_v4  ;;  %v36_v10 = vld [vmem:[%s1363_s6] sm:$0xff]  }
   0x4   :  { %v127_v7 = vsel %vm119_vm0, %v118_v3, 0  ;;  %924 = vmatpush3.bf16.xpose.msra.mxu0 %v1153_v8 }
   0x5   :  { %930 = vmatpush3.bf16.xpose.msra.mxu1 %v127_v7 }
   0x6   :  { %931 = vmatprep.subr.bf16.mxu1 %v1071_v2 }
   0x7   :  { %14 = vsyncpa [#allocation3], 0  ;;  %937 = vmatprep.subr.bf16.mxu0 %v1071_v2  ;;  %v124_v11 = vsel %vm119_vm0, %v117_v9, 0  ;;  %v104_v12 = vld [vmem:[%s1357_s0] sm:$0xff]  ;;  %v105_v13 = vld [vmem:[%s1357_s0 + $0x8] sm:$0xff]  ;;  %v1189_v22 = vunpack.c.l.bf16 %v36_v10  ;;  %v1191_v23 = vunpack.c.h.bf16 %v36_v10  ;;  %s1073_s11 = smov 16  }
   0x8   :  { %v106_v14 = vpack.c.bf16 %v105_v13, %v104_v12  ;;  %v107_v20 = vld [vmem:[%s1358_s1] sm:$0xff]  ;;  %v108_v21 = vld [vmem:[%s1358_s1 + $0x8] sm:$0xff] }
   0x9   :  { %v109_v25 = vpack.c.bf16 %v108_v21, %v107_v20  ;;  %v110_v4 = vld [vmem:[%s1359_s2] sm:$0xff]  ;;  %v111_v5 = vld [vmem:[%s1359_s2 + $0x8] sm:$0xff] }
   0xb   :  { %926 = vmatmul.mubr.msk.bf16.vlgmr.msra.gmra.mxu0 %vm50_vm2, %v36_v10  ;;  %v218_v31 = vsel %vm119_vm0, %v109_v25, 0 }
   0xc   :  { %938 = vmatpush3.bf16.xpose.msra.mxu0 %v1153_v8  ;;  %939 = vmatprep.mubr.msk.bf16.mxu0 %vm1072_vm1, %v1071_v2 }
   0xd   :  { %932 = vmatpush3.bf16.xpose.msra.mxu1 %v124_v11  ;;  %943 = vmatprep.subr.bf16.mxu0 %v1071_v2  ;;  %v112_v11 = vpack.c.bf16 %v111_v5, %v110_v4 }
   0xe   :  { %949 = vmatprep.subr.bf16.mxu1 %v1071_v2 }
  0x14   :  { %934 = vmatmul.mubr.msk.bf16.vlgmr.msra.gmra.mxu1 %vm119_vm0, %v106_v14 }
  0x15   :  { %950 = vmatpush3.bf16.msra.mxu1 %v1146_v6  ;;  %951 = vmatprep.mubr.msk.bf16.mxu1 %vm1072_vm1, %v1071_v2 }
  0x16   :  { %963 = vmatprep.subr.bf16.mxu1 %v1071_v2 }
  0xcb   :  { %v1179_v15 = vpop.f32.mrf.mxu0 }
  0xcc   :  { %vm98_vm3 = vcmp.gt.f32.partialorder %v1179_v15, 0.5 }
  0xcd   :  { %v927_v16 = vpop.f32.mrf.mxu0  ;;  %v1216_v55 = vsel %vm98_vm3, 1.0, %v1071_v2 }
  0xce   :  { %v877_v16 = vld [vmem:[%s1361_s4 + $0x38] sm:$0xff] }
  0xcf   :  { %v1181_v17 = vpop.f32.mrf.mxu0 }
  0xd0   :  { %vm99_vm4 = vcmp.gt.f32.partialorder %v1181_v17, 0.5 }
  0xd1   :  { %v928_v18 = vpop.f32.mrf.mxu0  ;;  %v1223_v59 = vsel %vm99_vm4, 1.0, %v1071_v2 }
  0xd4   :  { %v163_v19 = vpop.f32.mrf.mxu1 }
  0xd5   :  { %v170_v27 = vmul.f32 %v163_v19, %v1189_v22 }
  0xd6   :  { %v935_v24 = vpop.f32.mrf.mxu1 }
  0xd8   :  { %v166_v26 = vpop.f32.mrf.mxu1 }
  0xd9   :  { %v171_v28 = vmul.f32 %v166_v26, %v1191_v23 }
  0xda   :  { %v936_v29 = vpop.f32.mrf.mxu1 }
  0xdb   :  { %v172_v30 = vpack.c.bf16 %v171_v28, %v170_v27  ;;  %v874_v28 = vld [vmem:[%s1361_s4 + $0x20] sm:$0xff]  ;;  %v875_v29 = vld [vmem:[%s1361_s4 + $0x28] sm:$0xff] }
  0xdd   :  { %940 = vmatmul.mubr.msk.bf16.vlgmr.msra.gmra.mxu0 %vm50_vm2, %v172_v30 }
  0xde   :  { %944 = vmatpush3.bf16.xpose.msra.mxu0 %v218_v31  ;;  %945 = vmatprep.mubr.msk.bf16.mxu0 %vm1072_vm1, %v1071_v2  ;;  %v446_v31 = vpack.c.bf16 %v875_v29, %v874_v28  ;;  %v873_v28 = vld [vmem:[%s1359_s2 + $0x18] sm:$0xff] }
  0xdf   :  { %955 = vmatprep.subr.bf16.mxu0 %v1071_v2 }
  0xe5   :  { %946 = vmatmul.mubr.msk.bf16.vlgmr.msra.gmra.mxu0 %vm119_vm0, %v106_v14  ;;  %v876_v14 = vld [vmem:[%s1361_s4 + $0x30] sm:$0xff] }
  0xe6   :  { %956 = vmatpush3.bf16.msra.mxu0 %v118_v3  ;;  %959 = vmatprep.mubr.msk.bf16.mxu0 %vm1072_vm1, %v1071_v2  ;;  %v447_v19 = vpack.c.bf16 %v877_v16, %v876_v14 }
  0xe7   :  { %957 = vmatprep.subr.bf16.mxu0 %v1071_v2 }
  0xe8   :  { %v455_v26 = vsel %vm119_vm0, %v447_v19, 0 }
  0xea   :  { %958 = vmatpush3.bf16.msra.mxu0 %v117_v9 }
  0xeb   :  { %969 = vmatprep.subr.bf16.mxu0 %v1071_v2 }
 0x19d   :  { %v210_v32 = vpop.f32.mrf.mxu0 }
 0x19f   :  { %v941_v33 = vpop.f32.mrf.mxu0 }
 0x1a1   :  { %v213_v34 = vpop.f32.mrf.mxu0 }
 0x1a3   :  { %v942_v35 = vpop.f32.mrf.mxu0 }
 0x1a4   :  { %v868_v35 = vld [vmem:[%s1357_s0 + $0x10] sm:$0xff] }
 0x1a5   :  { %v254_v36 = vpop.f32.mrf.mxu0 }
 0x1a6   :  { %v255_v37 = vadd.f32 %v254_v36, %v210_v32  ;;  %v869_v36 = vld [vmem:[%s1357_s0 + $0x18] sm:$0xff] }
 0x1a7   :  { %v947_v38 = vpop.f32.mrf.mxu0 }
 0x1a8   :  { %v261_v39 = vmul.f32 0.25, %v255_v37  ;;  %v432_v37 = vpack.c.bf16 %v869_v36, %v868_v35 }
 0x1a9   :  { %v257_v40 = vpop.f32.mrf.mxu0 }
 0x1aa   :  { %v258_v41 = vadd.f32 %v257_v40, %v213_v34  ;;  %v263_v42 = vsel %vm98_vm3, %v261_v39, -1e+30  ;;  %v452_v34 = vsel %vm119_vm0, %v446_v31, 0 }
 0x1ab   :  { %v948_v43 = vpop.f32.mrf.mxu0  ;;  %v265_v44 = vsel %vm119_vm0, %v263_v42, -inf }
 0x1ac   :  { %v262_v45 = vmul.f32 0.25, %v258_v41  ;;  %266 = vmax.xlane.f32.xlu0 %v265_v44  ;;  %v870_v43 = vld [vmem:[%s1358_s1 + $0x10] sm:$0xff] }
 0x1ae   :  { %v264_v46 = vsel %vm99_vm4, %v262_v45, -1e+30 }
 0x1af   :  { %v268_v47 = vsel %vm119_vm0, %v264_v46, -inf }
 0x1b0   :  { %269 = vmax.xlane.f32.xlu0 %v268_v47 }
 0x235   :  { %v267_v48 = vpop.xlane.xlu0 %266 }
 0x236   :  { %v271_v49 = vsub.f32 %v263_v42, %v267_v48 }
 0x238   :  { %v273_v50 = vmul.f32 1.442695, %v271_v49 }
 0x239   :  { %v270_v51 = vpop.xlane.xlu0 %269 }
 0x23a   :  { %1033 = vpow2.f32 %v273_v50  ;;  %v272_v52 = vsub.f32 %v264_v46, %v270_v51 }
 0x23c   :  { %v275_v53 = vmul.f32 1.442695, %v272_v52 }
 0x23e   :  { %1035 = vpow2.f32 %v275_v53 }
 0x247   :  { %v1034_v54 = vpop.eup %1033 }
 0x248   :  { %v277_v56 = vmul.f32 %v1034_v54, %v1216_v55 }
 0x24a   :  { %v279_v57 = vsel %vm119_vm0, %v277_v56, 0.0 }
 0x24b   :  { %v1036_v58 = vpop.eup %1035  ;;  %280 = vadd.xlane.f32.xlu1 %v279_v57 }
 0x24c   :  { %v278_v60 = vmul.f32 %v1036_v58, %v1223_v59 }
 0x24e   :  { %v282_v61 = vsel %vm119_vm0, %v278_v60, 0.0 }
 0x24f   :  { %283 = vadd.xlane.f32.xlu1 %v282_v61 }
 0x2d4   :  { %v281_v62 = vpop.xlane.xlu1 %280 }
 0x2d5   :  { %v285_v63 = vmax.f32 %v281_v62, 1e-30 }
 0x2d7   :  { %1037 = vrcp.f32 %v285_v63 }
 0x2d8   :  { %v284_v0 = vpop.xlane.xlu1 %283 }
 0x2d9   :  { %v286_v1 = vmax.f32 %v284_v0, 1e-30 }
 0x2db   :  { %1039 = vrcp.f32 %v286_v1 }
 0x2e4   :  { %v1038_v3 = vpop.eup %1037 }
 0x2e5   :  { %v288_v9 = vmul.f32 %v1038_v3, %v277_v56 }
 0x2e8   :  { %v1040_v7 = vpop.eup %1039 }
 0x2e9   :  { %v290_v10 = vmul.f32 %v1040_v7, %v278_v60 }
 0x2eb   :  { %v291_v12 = vpack.c.bf16 %v290_v10, %v288_v9 }
 0x2ed   :  { %952 = vmatmul.mubr.msk.bf16.vlgmr.msra.gmra.mxu1 %vm119_vm0, %v291_v12 }
 0x2ee   :  { %964 = vmatpush3.bf16.msra.mxu1 %v112_v11  ;;  %965 = vmatprep.mubr.msk.bf16.mxu1 %vm1072_vm1, %v1071_v2 }
 0x2ef   :  { %977 = vmatprep.subr.bf16.mxu1 %v1071_v2 }
 0x2f5   :  { %966 = vmatmul.mubr.msk.bf16.vlgmr.msra.gmra.mxu1 %vm119_vm0, %v291_v12 }
 0x2f6   :  { %978 = vmatpush3.bf16.xpose.msra.mxu1 %v1153_v8  ;;  %979 = vmatprep.mubr.msk.bf16.mxu1 %vm1072_vm1, %v1071_v2 }
 0x2f7   :  { %983 = vmatprep.subr.bf16.mxu1 %v1071_v2 }
 0x3ad   :  { %v330_v13 = vpop.f32.mrf.mxu1 }
 0x3ae   :  { %v337_v21 = vmul.f32 %v330_v13, %v1189_v22 }
 0x3af   :  { %v953_v18 = vpop.f32.mrf.mxu1 }
 0x3b1   :  { %v333_v20 = vpop.f32.mrf.mxu1 }
 0x3b2   :  { %v338_v8 = vmul.f32 %v333_v20, %v1191_v23 }
 0x3b3   :  { %v954_v24 = vpop.f32.mrf.mxu1 }
 0x3b4   :  { %v339_v25 = vpack.c.bf16 %v338_v8, %v337_v21 }
 0x3b5   :  { %v1251_v27 = vpop.f32.mrf.mxu1 }
 0x3b6   :  { %960 = vmatmul.mubr.msk.bf16.vlgmr.msra.gmra.mxu0 %vm50_vm2, %v339_v25 }
 0x3b7   :  { %970 = vmatpush3.bf16.xpose.msra.mxu0 %v455_v26  ;;  %v967_v30 = vpop.f32.mrf.mxu1  ;;  %973 = vmatprep.mubr.msk.bf16.mxu0 %vm1072_vm1, %v1071_v2 }
 0x3b8   :  { %971 = vmatprep.subr.bf16.mxu0 %v1071_v2 }
 0x3b9   :  { %v1263_v32 = vpop.f32.mrf.mxu1 }
 0x3bb   :  { %v968_v33 = vpop.f32.mrf.mxu1 }
 0x3bf   :  { %972 = vmatpush3.bf16.xpose.msra.mxu0 %v452_v34 }
 0x3c0   :  { %989 = vmatprep.subr.bf16.mxu0 %v1071_v2 }
 0x3c6   :  { %974 = vmatmul.mubr.msk.bf16.vlgmr.msra.gmra.mxu0 %vm119_vm0, %v432_v37 }
 0x3c7   :  { %990 = vmatpush3.bf16.msra.mxu0 %v1146_v6  ;;  %991 = vmatprep.mubr.msk.bf16.mxu0 %vm1072_vm1, %v1071_v2  ;;  %v871_v6 = vld [vmem:[%s1358_s1 + $0x18] sm:$0xff] }
 0x3c8   :  { %1003 = vmatprep.subr.bf16.mxu0 %v1071_v2  ;;  %v436_v45 = vpack.c.bf16 %v871_v6, %v870_v43 }
 0x3ca   :  { %v546_v51 = vsel %vm119_vm0, %v436_v45, 0 }
 0x476   :  { %v1278_v38 = vpop.f32.mrf.mxu0 }
 0x478   :  { %v961_v39 = vpop.f32.mrf.mxu0 }
 0x47a   :  { %v1280_v40 = vpop.f32.mrf.mxu0 }
 0x47c   :  { %v962_v41 = vpop.f32.mrf.mxu0 }
 0x486   :  { %v491_v42 = vpop.f32.mrf.mxu0 }
 0x487   :  { %v498_v47 = vmul.f32 %v491_v42, %v1189_v22 }
 0x488   :  { %v975_v44 = vpop.f32.mrf.mxu0 }
 0x48a   :  { %v494_v46 = vpop.f32.mrf.mxu0 }
 0x48b   :  { %v499_v48 = vmul.f32 %v494_v46, %v1191_v23  ;;  %v1030_v46 = vld [vmem:[%s1364_s7 + $0x8] sm:$0xff]  }
 0x48c   :  { %v976_v49 = vpop.f32.mrf.mxu0 }
 0x48d   :  { %v500_v50 = vpack.c.bf16 %v499_v48, %v498_v47  ;;  %v884_v49 = vld [vmem:[%s1360_s3 + $0x10] sm:$0xff] }
 0x48f   :  { %980 = vmatmul.mubr.msk.bf16.vlgmr.msra.gmra.mxu1 %vm50_vm2, %v500_v50 }
 0x490   :  { %984 = vmatpush3.bf16.xpose.msra.mxu1 %v546_v51  ;;  %985 = vmatprep.mubr.msk.bf16.mxu1 %vm1072_vm1, %v1071_v2  ;;  %v885_v51 = vld [vmem:[%s1360_s3 + $0x18] sm:$0xff] }
 0x491   :  { %995 = vmatprep.subr.bf16.mxu1 %v1071_v2 }
 0x497   :  { %986 = vmatmul.mubr.msk.bf16.vlgmr.msra.gmra.mxu1 %vm119_vm0, %v432_v37 }
 0x498   :  { %996 = vmatpush3.bf16.msra.mxu1 %v447_v19  ;;  %999 = vmatprep.mubr.msk.bf16.mxu1 %vm1072_vm1, %v1071_v2 }
 0x499   :  { %997 = vmatprep.subr.bf16.mxu1 %v1071_v2 }
 0x49c   :  { %998 = vmatpush3.bf16.msra.mxu1 %v446_v31 }
 0x49d   :  { %1009 = vmatprep.subr.bf16.mxu1 %v1071_v2 }
 0x54f   :  { %v538_v52 = vpop.f32.mrf.mxu1 }
 0x551   :  { %v981_v53 = vpop.f32.mrf.mxu1 }
 0x553   :  { %v541_v54 = vpop.f32.mrf.mxu1 }
 0x555   :  { %v982_v56 = vpop.f32.mrf.mxu1 }
 0x557   :  { %v582_v57 = vpop.f32.mrf.mxu1 }
 0x558   :  { %v583_v58 = vadd.f32 %v582_v57, %v538_v52  ;;  %v419_v57 = vadd.f32 %v1251_v27, %v1278_v38 }
 0x559   :  { %v987_v60 = vpop.f32.mrf.mxu1 }
 0x55a   :  { %v589_v61 = vmul.f32 0.25, %v583_v58  ;;  %v422_v58 = vadd.f32 %v1263_v32, %v1280_v40  ;;  %v425_v60 = vld [vmem:[%s1360_s3] sm:$0xff] }
 0x55b   :  { %v585_v62 = vpop.f32.mrf.mxu1  ;;  %v886_v40 = vld [vmem:[%s1365_s8] ss:$0 sm:$0xff] }
 0x55c   :  { %v586_v63 = vadd.f32 %v585_v62, %v541_v54  ;;  %v591_v0 = vsel %vm98_vm3, %v589_v61, -1e+30  ;;  %v426_v61 = vld [vmem:[%s1360_s3 + $0x8] sm:$0xff]  ;;  %s1074_s3 = smov [#allocation2]  }
 0x55d   :  { %v988_v1 = vpop.f32.mrf.mxu1  ;;  %v593_v3 = vsel %vm119_vm0, %v591_v0, -inf  ;;  %s846_s17 = sshll.u32 %s1074_s3, 4  ;;  %s847_s17 = int_to_ptr.vmem [resolvable:$true] %s846_s17 }
 0x55e   :  { %v590_v4 = vmul.f32 0.25, %v586_v63  ;;  %594 = vmax.xlane.f32.xlu0 %v593_v3  ;;  %v427_v63 = vadd.f32 %v425_v60, %v419_v57  ;;  %s1049_s18 = scalar_lea.vmem %s847_s17, 256  ;;  %p1054_p1 = scmp.lt.s32.totalorder %s847_s17, %s847_s17 }
 0x55f   :  { %p1050_p0 = scmp.ne.s32.totalorder %s847_s17, %s1049_s18  ;;  %p1055_p2 = scmp.lt.s32.totalorder %s1049_s18, %s1049_s18 }
 0x560   :  { %v592_v5 = vsel %vm99_vm4, %v590_v4, -1e+30 }
 0x561   :  { %v596_v7 = vsel %vm119_vm0, %v592_v5, -inf  ;;  %p1056_p3 = por %p1055_p2, %p1054_p1 }
 0x562   :  { %597 = vmax.xlane.f32.xlu1 %v596_v7 }
 0x563   :  { %p1057_p4 = pnand %p1056_p3, %p1050_p0 }
 0x5e7   :  { %v595_v9 = vpop.xlane.xlu0 %594 }
 0x5e8   :  { %v599_v10 = vsub.f32 %v591_v0, %v595_v9  ;;  %v428_v0 = vadd.f32 %v426_v61, %v422_v58 }
 0x5ea   :  { %v601_v11 = vmul.f32 1.442695, %v599_v10 }
 0x5eb   :  { %v598_v12 = vpop.xlane.xlu1 %597 }
 0x5ec   :  { %1041 = vpow2.f32 %v601_v11  ;;  %v600_v13 = vsub.f32 %v592_v5, %v598_v12 }
 0x5ee   :  { %v603_v14 = vmul.f32 1.442695, %v600_v13 }
 0x5f0   :  { %1043 = vpow2.f32 %v603_v14 }
 0x5f9   :  { %v1042_v15 = vpop.eup %1041 }
 0x5fa   :  { %v605_v16 = vmul.f32 %v1042_v15, %v1216_v55  ;;  %v872_v55 = vld [vmem:[%s1359_s2 + $0x10] sm:$0xff] }
 0x5fb   :  { %v440_v31 = vpack.c.bf16 %v873_v28, %v872_v55 }
 0x5fc   :  { %v607_v18 = vsel %vm119_vm0, %v605_v16, 0.0 }
 0x5fd   :  { %v1044_v19 = vpop.eup %1043  ;;  %608 = vadd.xlane.f32.xlu0 %v607_v18 }
 0x5fe   :  { %v606_v17 = vmul.f32 %v1044_v19, %v1223_v59 }
 0x600   :  { %v610_v20 = vsel %vm119_vm0, %v606_v17, 0.0 }
 0x601   :  { %611 = vadd.xlane.f32.xlu1 %v610_v20 }
 0x686   :  { %v609_v21 = vpop.xlane.xlu0 %608 }
 0x687   :  { %v613_v8 = vmax.f32 %v609_v21, 1e-30 }
 0x689   :  { %1045 = vrcp.f32 %v613_v8 }
 0x68a   :  { %v612_v24 = vpop.xlane.xlu1 %611 }
 0x68b   :  { %v614_v25 = vmax.f32 %v612_v24, 1e-30 }
 0x68d   :  { %1047 = vrcp.f32 %v614_v25 }
 0x696   :  { %v1046_v26 = vpop.eup %1045 }
 0x697   :  { %v616_v59 = vmul.f32 %v1046_v26, %v605_v16 }
 0x69a   :  { %v1048_v29 = vpop.eup %1047 }
 0x69b   :  { %v618_v30 = vmul.f32 %v1048_v29, %v606_v17 }
 0x69d   :  { %v619_v33 = vpack.c.bf16 %v618_v30, %v616_v59 }
 0x69f   :  { %992 = vmatmul.mubr.msk.bf16.vlgmr.msra.gmra.mxu0 %vm119_vm0, %v619_v33 }
 0x6a0   :  { %1004 = vmatpush3.bf16.msra.mxu0 %v440_v31  ;;  %1005 = vmatprep.mubr.msk.bf16.mxu0 %vm1072_vm1, %v1071_v2 }
 0x6a7   :  { %1006 = vmatmul.mubr.msk.bf16.vlgmr.msra.gmra.mxu0 %vm119_vm0, %v619_v33 }
 0x75f   :  { %v657_v34 = vpop.f32.mrf.mxu0 }
 0x760   :  { %v664_v37 = vmul.f32 %v657_v34, %v1189_v22 }
 0x761   :  { %v993_v35 = vpop.f32.mrf.mxu0 }
 0x763   :  { %v660_v36 = vpop.f32.mrf.mxu0 }
 0x764   :  { %v665_v39 = vmul.f32 %v660_v36, %v1191_v23  ;;  %v1031_v23 = vld [vmem:[%s1364_s7] sm:$0xff]  }
 0x765   :  { %v994_v41 = vpop.f32.mrf.mxu0 }
 0x766   :  { %v666_v42 = vpack.c.bf16 %v665_v39, %v664_v37 }
 0x767   :  { %v745_v43 = vpop.f32.mrf.mxu0 }
 0x768   :  { %1000 = vmatmul.mubr.msk.bf16.vlgmr.msra.gmra.mxu1 %vm50_vm2, %v666_v42 }
 0x769   :  { %v1007_v6 = vpop.f32.mrf.mxu0  ;;  %1013 = vmatprep.mubr.msk.bf16.mxu1 %vm1072_vm1, %v1071_v2  ;;  %1010 = vmatpush3.bf16.msra.mxu1 %v1030_v46 }
 0x76a   :  { %1011 = vmatprep.subr.bf16.mxu1 %v1071_v2 }
 0x76b   :  { %v748_v44 = vpop.f32.mrf.mxu0 }
 0x76d   :  { %v1008_v45 = vpop.f32.mrf.mxu0  ;;  %1012 = vmatpush3.bf16.msra.mxu1 %v1031_v23 }
 0x828   :  { %v704_v22 = vpop.f32.mrf.mxu1 }
 0x829   :  { %v746_v48 = vadd.f32 %v745_v43, %v704_v22 }
 0x82a   :  { %v1001_v47 = vpop.f32.mrf.mxu1 }
 0x82b   :  { %v755_v2 = vadd.f32 %v884_v49, %v746_v48 }
 0x82c   :  { %v707_v50 = vpop.f32.mrf.mxu1 }
 0x82d   :  { %v749_v52 = vadd.f32 %v748_v44, %v707_v50 }
 0x82e   :  { %v1002_v53 = vpop.f32.mrf.mxu1 }
 0x82f   :  { %v756_v54 = vadd.f32 %v885_v51, %v749_v52 }
 0x831   :  { %v1023_v56 = vpack.i.bf16 %v756_v54, %v755_v2 }
 0x833   :  { %1024 = vrot.lane.b32.xlu0 %v1023_v56, %s1073_s11 }
 0x8a5   :  { %v1025_v62 = vpop.permute.xlu0 %1024 }
 0x8a6   :  { %v1027_v1 = vunpack.i.h.bf16 %v1025_v62  ;;  %v1026_v3 = vunpack.i.l.bf16 %v1025_v62 }
 0x8a8   :  { %v766_v4 = vsel %vm119_vm0, %v428_v0, %v1027_v1  ;;  %v765_v27 = vsel %vm119_vm0, %v427_v63, %v1026_v3 }
 0x8a9   :  { %v768_v38 = vmax.f32 %v766_v4, 0.0  ;;  %v767_v5 = vmax.f32 %v765_v27, 0.0 }
 0x8ab   :  { %v769_v32 = vpack.c.bf16 %v768_v38, %v767_v5 }
 0x8ad   :  { %1014 = vmatmul.mubr.msk.bf16.vlgmr.msra.gmra.mxu1 %vm50_vm2, %v769_v32 }
 0x96d   :  { %v830_v7 = vpop.f32.mrf.mxu1 }
 0x96e   :  { %v831_v9 = vadd.f32 %v886_v40, %v830_v7 }
 0x96f   :  { %v1015_v10 = vpop.f32.mrf.mxu1 }
 0x970   :  { %v837_v11 = vmax.f32 %v831_v9, 0.0 }
 0x971   :  { %v833_v12 = vpop.f32.mrf.mxu1 }
 0x972   :  { %839 = vst [vmem:[#allocation2] sm:$0xff] %v837_v11  ;;  %v834_v13 = vadd.f32 %v886_v40, %v833_v12 }
 0x973   :  { %v1016_v14 = vpop.f32.mrf.mxu1 }
 0x974   :  { %v838_v15 = vmax.f32 %v834_v13, 0.0 }
 0x976   :  { %840 = vst [vmem:[#allocation2 + $0x8] sm:$0xff] %v838_v15 }
 0x977   :  { %1060 = shalt.err (!%p1057_p4)
}
 0x978   :  { %s1075_s8 = smov 128   ;;  %s1076_s19 = smov 8  }
 0x979   :  { %852 = dma.vmem_to_hbm [thread:$0]  %s847_s17, 256, %s1366_s9, [#allocation3], %s1075_s8, %s1075_s8, %s1076_s19  }
 0x97a   :  { %1069 = dma.done.wait [#allocation3], 256  }
 0x97b   :  { %1070 = vsyncadd [#allocation3], 4294967040 }
 0x97c   :  { %856 = vsyncpa [#allocation3], 1 }

</bundles_post_ra>
